<compile_context>
chip_gen: v7x
topology: tpu7x:2x2x1
jax: 0.10.0
libtpu: 0.0.40
codegen_flags: <defaults>
</compile_context>

<pallas_src>
import functools

import jax
import jax.numpy as jnp
from jax import lax
from jax.experimental import pallas as pl
from jax.experimental.pallas import tpu as pltpu


def _round_up(a, b):
    return (a + b - 1) // b * b


def am_softmax_kernel(x_ref, w_ref, label_ref, out_ref,
                      xn_ref, m_ref, l_ref, pos_ref,
                      *, margin, scale, num_classes):
    c = pl.program_id(1)
    num_c = pl.num_programs(1)

    # --- once per B tile: normalize x (f32), cache as bf16; init running stats.
    @pl.when(c == 0)
    def _init():
        x = x_ref[...]                                     # (TB, D) f32
        ss = jnp.sum(x * x, axis=1, keepdims=True)
        # clamp(norm, 1e-12) == sqrt(max(ss, 1e-24)); rsqrt -> EUP, mul not div.
        xn = x * lax.rsqrt(jnp.maximum(ss, jnp.float32(1e-24)))
        xn_ref[...] = xn.astype(jnp.bfloat16)
        m_ref[...] = jnp.full_like(m_ref, -jnp.inf)
        l_ref[...] = jnp.zeros_like(l_ref)
        pos_ref[...] = jnp.zeros_like(pos_ref)

    # --- cosine similarities for this class tile: bf16 operands, f32 accumulate.
    sim = jnp.dot(xn_ref[...], w_ref[...],
                  preferred_element_type=jnp.float32)      # (TB, TC) f32

    tb, tc = sim.shape
    col = lax.broadcasted_iota(jnp.int32, (tb, tc), 1)     # local column ids
    lbl_rel = label_ref[...] - c * tc                      # (TB, 1) int32 (scalar shift)
    one_hot = col == lbl_rel
    valid = col < (num_classes - c * tc)                   # mask padded classes

    logits = jnp.float32(scale) * sim
    logits = jnp.where(one_hot, logits - jnp.float32(scale * margin), logits)
    logits = jnp.where(valid, logits, jnp.float32(-1e30))

    # correct-class logit (exactly one hit per row over the whole C sweep)
    pos_ref[...] += jnp.sum(jnp.where(one_hot, logits, jnp.float32(0.0)),
                            axis=1, keepdims=True)

    # online (streaming) logsumexp over the class axis
    m_prev = m_ref[...]
    m_new = jnp.maximum(m_prev, jnp.max(logits, axis=1, keepdims=True))
    l_ref[...] = (l_ref[...] * jnp.exp(m_prev - m_new)
                  + jnp.sum(jnp.exp(logits - m_new), axis=1, keepdims=True))
    m_ref[...] = m_new

    # --- last class tile: per-row cross-entropy loss.
    @pl.when(c == num_c - 1)
    def _finalize():
        lse = m_ref[...] + jnp.log(l_ref[...])
        out_ref[...] = lse - pos_ref[...]


def am_softmax_loss(x, weight, label, *, margin=0.3, scale=15.0,
                    block_b=None, block_c=None):
    """x: (B, nOut), weight: (nOut, nClasses), label: (B,) int32 -> scalar loss."""
    x = x.astype(jnp.float32)
    weight = weight.astype(jnp.float32)
    B, D = x.shape
    D2, C = weight.shape
    assert D == D2

    # Hoisted: normalize W columns once (dim=0 of (nOut, nClasses)), bf16 for MXU.
    w_ss = jnp.sum(weight * weight, axis=0, keepdims=True)
    w_norm = (weight * lax.rsqrt(jnp.maximum(w_ss, 1e-24))).astype(jnp.bfloat16)

    if block_b is None:
        block_b = min(256, _round_up(B, 8))
    if block_c is None:
        # bigger class tile = fewer grid steps on the streamed ("arbitrary") axis.
        block_c = min(512, _round_up(C, 128))

    Bp = _round_up(B, block_b)
    Cp = _round_up(C, block_c)

    x_p = jnp.pad(x, ((0, Bp - B), (0, 0))) if Bp != B else x
    w_p = jnp.pad(w_norm, ((0, 0), (0, Cp - C))) if Cp != C else w_norm
    lbl = label.astype(jnp.int32).reshape(-1, 1)
    lbl_p = jnp.pad(lbl, ((0, Bp - B), (0, 0))) if Bp != B else lbl

    grid = (Bp // block_b, Cp // block_c)

    # Explicit VMEM budget (double-buffered inputs + scratch), generous headroom,
    # capped at 32 MiB so it is safe on v5e/v6e/v7x alike.
    est = (2 * (block_b * D * 4 + D * block_c * 2 + 2 * block_b * 128 * 4)
           + block_b * D * 2 + 3 * block_b * 128 * 4)
    vmem_limit = int(min(32 * 1024 * 1024, max(16 * 1024 * 1024, 4 * est)))

    cost = pl.CostEstimate(
        flops=2 * Bp * D * Cp,
        transcendentals=Bp * Cp,                     # exp() in the online softmax
        bytes_accessed=Bp * D * 4 + D * Cp * 2 + Bp * 4 + Bp * 4)

    kernel = functools.partial(am_softmax_kernel, margin=float(margin),
                               scale=float(scale), num_classes=C)

    per_row = pl.pallas_call(
        kernel,
        out_shape=jax.ShapeDtypeStruct((Bp, 1), jnp.float32),
        grid_spec=pltpu.PrefetchScalarGridSpec(
            num_scalar_prefetch=0,
            grid=grid,
            in_specs=[
                pl.BlockSpec((block_b, D), lambda b, c: (b, 0)),    # x (f32)
                pl.BlockSpec((D, block_c), lambda b, c: (0, c)),    # w_norm (bf16)
                pl.BlockSpec((block_b, 1), lambda b, c: (b, 0)),    # labels
            ],
            out_specs=pl.BlockSpec((block_b, 1), lambda b, c: (b, 0)),
            scratch_shapes=[
                pltpu.VMEM((block_b, D), jnp.bfloat16),   # cached x_norm
                pltpu.VMEM((block_b, 1), jnp.float32),    # running max
                pltpu.VMEM((block_b, 1), jnp.float32),    # running sum
                pltpu.VMEM((block_b, 1), jnp.float32),    # correct-class logit
            ]),
        compiler_params=pltpu.CompilerParams(
            dimension_semantics=("parallel", "arbitrary"),
            vmem_limit_bytes=vmem_limit),
        cost_estimate=cost,
    )(x_p, w_p, lbl_p)

    # Final mean outside the kernel (keeps B tiles independent / parallel).
    return jnp.mean(per_row[:B, 0])


if __name__ == "__main__":
    B, nOut, nClasses = 16, 32, 200          # small, exercises 2 B-tiles x 2 C-tiles
    margin, scale = 0.3, 15.0

    key = jax.random.PRNGKey(0)
    kx, kw, kl = jax.random.split(key, 3)

    x = jax.random.normal(kx, (B, nOut), dtype=jnp.float32)
    # xavier_normal-style init for W (nOut, nClasses)
    std = (2.0 / (nOut + nClasses)) ** 0.5
    W = std * jax.random.normal(kw, (nOut, nClasses), dtype=jnp.float32)
    label = jax.random.randint(kl, (B,), 0, nClasses, dtype=jnp.int32)

    loss = am_softmax_loss(x, W, label, margin=margin, scale=scale,
                           block_b=8, block_c=128)
    loss = jax.block_until_ready(loss)

    # Pure-JAX reference with the same numerics (f32 normalize, bf16 MXU
    # operands, f32 accumulation, additive-margin scaled cross-entropy).
    xn = x * lax.rsqrt(jnp.maximum(jnp.sum(x * x, axis=1, keepdims=True), 1e-24))
    wn = W * lax.rsqrt(jnp.maximum(jnp.sum(W * W, axis=0, keepdims=True), 1e-24))
    costh = jnp.dot(xn.astype(jnp.bfloat16), wn.astype(jnp.bfloat16),
                    preferred_element_type=jnp.float32)
    oh = jax.nn.one_hot(label, nClasses, dtype=jnp.float32)
    logits_ref = scale * (costh - margin * oh)
    lse = jax.scipy.special.logsumexp(logits_ref, axis=1)
    ref = jnp.mean(lse - jnp.sum(logits_ref * oh, axis=1))

    assert jnp.allclose(loss, ref, rtol=1e-3, atol=1e-3), (float(loss), float(ref))
    print("KERNEL_OK")
</pallas_src>

<mosaic_0001>
module attributes {stable_mosaic.version = 11 : i64} {
  func.func @am_softmax_kernel(%arg0: i32, %arg1: i32, %arg2: memref<8x32xf32, #tpu.memory_space<vmem>>, %arg3: memref<32x128xbf16, #tpu.memory_space<vmem>>, %arg4: memref<8x1xi32, #tpu.memory_space<vmem>>, %arg5: memref<8x1xf32, #tpu.memory_space<vmem>>, %arg6: memref<8x32xbf16, #tpu.memory_space<vmem>>, %arg7: memref<8x1xf32, #tpu.memory_space<vmem>>, %arg8: memref<8x1xf32, #tpu.memory_space<vmem>>, %arg9: memref<8x1xf32, #tpu.memory_space<vmem>>) attributes {dimension_semantics = [#tpu.dimension_semantics<parallel>, #tpu.dimension_semantics<arbitrary>], iteration_bounds = array<i64: 2, 2>, scalar_prefetch = 0 : i64, scratch_operands = 4 : i64, tpu.core_type = #tpu.core_type<tc>, window_params = [{transform_indices = @transform_0, window_bounds = array<i64: 8, 32>}, {transform_indices = @transform_1, window_bounds = array<i64: 32, 128>}, {transform_indices = @transform_2, window_bounds = array<i64: 8, 1>}, {transform_indices = @transform_3, window_bounds = array<i64: 8, 1>}]} {
    %c0_i32 = arith.constant 0 : i32
    %0 = arith.cmpi eq, %arg1, %c0_i32 : i32
    %1 = arith.extui %0 : i1 to i32
    %c0_i32_0 = arith.constant 0 : i32
    %2 = arith.cmpi ne, %1, %c0_i32_0 : i32
    scf.if %2 {
      %c0_27 = arith.constant 0 : index
      %c0_28 = arith.constant 0 : index
      %50 = vector.load %arg2[%c0_27, %c0_28] : memref<8x32xf32, #tpu.memory_space<vmem>>, vector<8x32xf32>
      %51 = arith.mulf %50, %50 : vector<8x32xf32>
      %cst_29 = arith.constant dense<0.000000e+00> : vector<8xf32>
      %52 = vector.multi_reduction <add>, %51, %cst_29 [1] : vector<8x32xf32> to vector<8xf32>
      %53 = vector.shape_cast %52 : vector<8xf32> to vector<8x1xf32>
      %cst_30 = arith.constant 1.000000e-24 : f32
      %54 = vector.broadcast %cst_30 : f32 to vector<8x1xf32>
      %55 = arith.maximumf %53, %54 : vector<8x1xf32>
      %56 = math.rsqrt %55 : vector<8x1xf32>
      %57 = vector.broadcast %56 : vector<8x1xf32> to vector<8x32xf32>
      %58 = arith.mulf %50, %57 : vector<8x32xf32>
      %59 = arith.truncf %58 : vector<8x32xf32> to vector<8x32xbf16>
      %c0_31 = arith.constant 0 : index
      %c0_32 = arith.constant 0 : index
      %60 = vector.load %arg6[%c0_31, %c0_32] : memref<8x32xbf16, #tpu.memory_space<vmem>>, vector<8x32xbf16>
      tpu.vector_store %arg6[%c0_31, %c0_32], %59 {strides = array<i32>} : memref<8x32xbf16, #tpu.memory_space<vmem>>, vector<8x32xbf16>,
      %cst_33 = arith.constant 0xFF800000 : f32
      %61 = vector.broadcast %cst_33 : f32 to vector<8x1xf32>
      %c0_34 = arith.constant 0 : index
      %c0_35 = arith.constant 0 : index
      %62 = vector.load %arg7[%c0_34, %c0_35] : memref<8x1xf32, #tpu.memory_space<vmem>>, vector<8x1xf32>
      tpu.vector_store %arg7[%c0_34, %c0_35], %61 {strides = array<i32>} : memref<8x1xf32, #tpu.memory_space<vmem>>, vector<8x1xf32>,
      %cst_36 = arith.constant 0.000000e+00 : f32
      %63 = vector.broadcast %cst_36 : f32 to vector<8x1xf32>
      %c0_37 = arith.constant 0 : index
      %c0_38 = arith.constant 0 : index
      %64 = vector.load %arg8[%c0_37, %c0_38] : memref<8x1xf32, #tpu.memory_space<vmem>>, vector<8x1xf32>
      tpu.vector_store %arg8[%c0_37, %c0_38], %63 {strides = array<i32>} : memref<8x1xf32, #tpu.memory_space<vmem>>, vector<8x1xf32>,
      %cst_39 = arith.constant 0.000000e+00 : f32
      %65 = vector.broadcast %cst_39 : f32 to vector<8x1xf32>
      %c0_40 = arith.constant 0 : index
      %c0_41 = arith.constant 0 : index
      %66 = vector.load %arg9[%c0_40, %c0_41] : memref<8x1xf32, #tpu.memory_space<vmem>>, vector<8x1xf32>
      tpu.vector_store %arg9[%c0_40, %c0_41], %65 {strides = array<i32>} : memref<8x1xf32, #tpu.memory_space<vmem>>, vector<8x1xf32>,
    } else {
    }
    %c0 = arith.constant 0 : index
    %c0_1 = arith.constant 0 : index
    %3 = vector.load %arg6[%c0, %c0_1] : memref<8x32xbf16, #tpu.memory_space<vmem>>, vector<8x32xbf16>
    %c0_2 = arith.constant 0 : index
    %c0_3 = arith.constant 0 : index
    %4 = vector.load %arg3[%c0_2, %c0_3] : memref<32x128xbf16, #tpu.memory_space<vmem>>, vector<32x128xbf16>
    %cst = arith.constant dense<0.000000e+00> : vector<8x128xf32>
    %5 = tpu.matmul %3, %4, %cst {dimension_numbers = #tpu.dot_dimension_numbers<[1], [0], [0], [1], [0, 0, 1, 1], [], []>} : vector<8x32xbf16>, vector<32x128xbf16>, vector<8x128xf32> -> vector<8x128xf32>
    %6 = tpu.iota {dimensions = array<i32: 1>} : vector<8x128xi32>
    %c0_4 = arith.constant 0 : index
    %c0_5 = arith.constant 0 : index
    %7 = vector.load %arg4[%c0_4, %c0_5] : memref<8x1xi32, #tpu.memory_space<vmem>>, vector<8x1xi32>
    %c128_i32 = arith.constant 128 : i32
    %8 = arith.muli %arg1, %c128_i32 : i32
    %9 = vector.broadcast %8 : i32 to vector<8x1xi32>
    %10 = arith.subi %7, %9 : vector<8x1xi32>
    %11 = vector.broadcast %10 : vector<8x1xi32> to vector<8x128xi32>
    %12 = arith.cmpi eq, %6, %11 : vector<8x128xi32>
    %c128_i32_6 = arith.constant 128 : i32
    %13 = arith.muli %arg1, %c128_i32_6 : i32
    %c200_i32 = arith.constant 200 : i32
    %14 = arith.subi %c200_i32, %13 : i32
    %15 = vector.broadcast %14 : i32 to vector<8x128xi32>
    %16 = arith.cmpi slt, %6, %15 : vector<8x128xi32>
    %cst_7 = arith.constant 1.500000e+01 : f32
    %17 = vector.broadcast %cst_7 : f32 to vector<8x128xf32>
    %18 = arith.mulf %17, %5 : vector<8x128xf32>
    %cst_8 = arith.constant 4.500000e+00 : f32
    %19 = vector.broadcast %cst_8 : f32 to vector<8x128xf32>
    %20 = arith.subf %18, %19 : vector<8x128xf32>
    %21 = arith.select %12, %20, %18 : vector<8x128xi1>, vector<8x128xf32>
    %cst_9 = arith.constant -1.000000e+30 : f32
    %22 = vector.broadcast %cst_9 : f32 to vector<8x128xf32>
    %23 = arith.select %16, %21, %22 : vector<8x128xi1>, vector<8x128xf32>
    %c0_10 = arith.constant 0 : index
    %c0_11 = arith.constant 0 : index
    %24 = vector.load %arg9[%c0_10, %c0_11] : memref<8x1xf32, #tpu.memory_space<vmem>>, vector<8x1xf32>
    %cst_12 = arith.constant 0.000000e+00 : f32
    %25 = vector.broadcast %cst_12 : f32 to vector<8x128xf32>
    %26 = arith.select %12, %23, %25 : vector<8x128xi1>, vector<8x128xf32>
    %cst_13 = arith.constant dense<0.000000e+00> : vector<8xf32>
    %27 = vector.multi_reduction <add>, %26, %cst_13 [1] : vector<8x128xf32> to vector<8xf32>
    %28 = vector.shape_cast %27 : vector<8xf32> to vector<8x1xf32>
    %29 = arith.addf %24, %28 : vector<8x1xf32>
    %c0_14 = arith.constant 0 : index
    %c0_15 = arith.constant 0 : index
    %30 = vector.load %arg9[%c0_14, %c0_15] : memref<8x1xf32, #tpu.memory_space<vmem>>, vector<8x1xf32>
    tpu.vector_store %arg9[%c0_14, %c0_15], %29 {strides = array<i32>} : memref<8x1xf32, #tpu.memory_space<vmem>>, vector<8x1xf32>,
    %c0_16 = arith.constant 0 : index
    %c0_17 = arith.constant 0 : index
    %31 = vector.load %arg7[%c0_16, %c0_17] : memref<8x1xf32, #tpu.memory_space<vmem>>, vector<8x1xf32>
    %cst_18 = arith.constant dense<0xFF800000> : vector<8xf32>
    %32 = vector.multi_reduction <maximumf>, %23, %cst_18 [1] : vector<8x128xf32> to vector<8xf32>
    %33 = vector.shape_cast %32 : vector<8xf32> to vector<8x1xf32>
    %34 = arith.maximumf %31, %33 : vector<8x1xf32>
    %c0_19 = arith.constant 0 : index
    %c0_20 = arith.constant 0 : index
    %35 = vector.load %arg8[%c0_19, %c0_20] : memref<8x1xf32, #tpu.memory_space<vmem>>, vector<8x1xf32>
    %36 = arith.subf %31, %34 : vector<8x1xf32>
    %37 = math.exp %36 : vector<8x1xf32>
    %38 = arith.mulf %35, %37 : vector<8x1xf32>
    %39 = vector.broadcast %34 : vector<8x1xf32> to vector<8x128xf32>
    %40 = arith.subf %23, %39 : vector<8x128xf32>
    %41 = math.exp %40 : vector<8x128xf32>
    %cst_21 = arith.constant dense<0.000000e+00> : vector<8xf32>
    %42 = vector.multi_reduction <add>, %41, %cst_21 [1] : vector<8x128xf32> to vector<8xf32>
    %43 = vector.shape_cast %42 : vector<8xf32> to vector<8x1xf32>
    %44 = arith.addf %38, %43 : vector<8x1xf32>
    %c0_22 = arith.constant 0 : index
    %c0_23 = arith.constant 0 : index
    %45 = vector.load %arg8[%c0_22, %c0_23] : memref<8x1xf32, #tpu.memory_space<vmem>>, vector<8x1xf32>
    tpu.vector_store %arg8[%c0_22, %c0_23], %44 {strides = array<i32>} : memref<8x1xf32, #tpu.memory_space<vmem>>, vector<8x1xf32>,
    %c0_24 = arith.constant 0 : index
    %c0_25 = arith.constant 0 : index
    %46 = vector.load %arg7[%c0_24, %c0_25] : memref<8x1xf32, #tpu.memory_space<vmem>>, vector<8x1xf32>
    tpu.vector_store %arg7[%c0_24, %c0_25], %34 {strides = array<i32>} : memref<8x1xf32, #tpu.memory_space<vmem>>, vector<8x1xf32>,
    %c1_i32 = arith.constant 1 : i32
    %47 = arith.cmpi eq, %arg1, %c1_i32 : i32
    %48 = arith.extui %47 : i1 to i32
    %c0_i32_26 = arith.constant 0 : i32
    %49 = arith.cmpi ne, %48, %c0_i32_26 : i32
    scf.if %49 {
      %c0_27 = arith.constant 0 : index
      %c0_28 = arith.constant 0 : index
      %50 = vector.load %arg7[%c0_27, %c0_28] : memref<8x1xf32, #tpu.memory_space<vmem>>, vector<8x1xf32>
      %c0_29 = arith.constant 0 : index
      %c0_30 = arith.constant 0 : index
      %51 = vector.load %arg8[%c0_29, %c0_30] : memref<8x1xf32, #tpu.memory_space<vmem>>, vector<8x1xf32>
      %52 = math.log %51 : vector<8x1xf32>
      %53 = arith.addf %50, %52 : vector<8x1xf32>
      %c0_31 = arith.constant 0 : index
      %c0_32 = arith.constant 0 : index
      %54 = vector.load %arg9[%c0_31, %c0_32] : memref<8x1xf32, #tpu.memory_space<vmem>>, vector<8x1xf32>
      %55 = arith.subf %53, %54 : vector<8x1xf32>
      %c0_33 = arith.constant 0 : index
      %c0_34 = arith.constant 0 : index
      %56 = vector.load %arg5[%c0_33, %c0_34] : memref<8x1xf32, #tpu.memory_space<vmem>>, vector<8x1xf32>
      tpu.vector_store %arg5[%c0_33, %c0_34], %55 {strides = array<i32>} : memref<8x1xf32, #tpu.memory_space<vmem>>, vector<8x1xf32>,
    } else {
    }
    return
  }
  func.func @transform_0(%arg0: i32, %arg1: i32) -> (i32, i32) {
    %c0_i32 = arith.constant 0 : i32
    %c0_i32_0 = arith.constant 0 : i32
    return %arg0, %c0_i32 : i32, i32
  }
  func.func @transform_1(%arg0: i32, %arg1: i32) -> (i32, i32) {
    %c0_i32 = arith.constant 0 : i32
    %c0_i32_0 = arith.constant 0 : i32
    return %c0_i32, %arg1 : i32, i32
  }
  func.func @transform_2(%arg0: i32, %arg1: i32) -> (i32, i32) {
    %c0_i32 = arith.constant 0 : i32
    %c0_i32_0 = arith.constant 0 : i32
    return %arg0, %c0_i32 : i32, i32
  }
  func.func @transform_3(%arg0: i32, %arg1: i32) -> (i32, i32) {
    %c0_i32 = arith.constant 0 : i32
    %c0_i32_0 = arith.constant 0 : i32
    return %arg0, %c0_i32 : i32, i32
  }
}

</mosaic_0001>

<bundles_post_ra>
// kernel: tpu_custom_call.1
= control target key start
LH: loop header
LB: loop body
LE: loop exit
PB: predicated region body
PF: predicated region fallthrough
CT: control target
= control target key end

     0   :  { %8 = vsyncpa [#allocation7], 0  ;;  %s904_s0 = inlined_call_operand.vmem [shape: f32[16,32], index: 0, kind: input, shape index: {}]   ;;  %s905_s1 = inlined_call_operand.hbm [shape: bf16[32,256], index: 1, kind: input, shape index: {}]   ;;  %s906_s2 = inlined_call_operand.vmem [shape: s32[16,1], index: 2, kind: input, shape index: {}]   ;;  %s907_s3 = inlined_call_operand.vmem [shape: f32[16,1], index: 3, kind: output, shape index: {}]  }
   0x1   :  { %10 = vsyncpa [#allocation7 + $0x1], 0  ;;  %s723_s12 = smov 0   ;;  %s725_s13 = smov 0  }
   0x2   :  { %s727_s14 = smov 0   ;;  %s729_s15 = smov 0  }
   0x3   :  { %s731_s16 = smov 0   ;;  %s733_s17 = smov 0  }
   0x4   :  { %s735_s18 = smov 0   ;;  %s737_s19 = smov 0  }
   0x5 LB: > { %s474_s20 = sadd.s32 4294967295, %s692_s19   ;;  %s25_s21 = sadd.s32 1, %s684_s17  ;;  %s692_s19 = sphi %s737_s19, %s16_s19   ;;  %s688_s18 = sphi %s735_s18, %s918_s18   ;;  %s684_s17 = sphi %s733_s17, %s917_s17   ;;  %s680_s16 = sphi %s731_s16, %s916_s16   ;;  %s676_s15 = sphi %s729_s15, %s915_s15   ;;  %s672_s14 = sphi %s727_s14, %s914_s14   ;;  %s668_s13 = sphi %s725_s13, %s913_s13   ;;  %s664_s12 = sphi %s723_s12, %s912_s12  }
   0x6   : > { %p26_p0 = scmp.ge.s32.totalorder %s25_s21, 2  ;;  %s28_s22 = sadd.s32 1, %s688_s18 }
   0x7   : > { %s61_s23 = sadd.s32 1, %s672_s14  ;;  %p68_p1 = scmp.ne.s32.totalorder %s672_s14, %s668_s13 }
   0x8   : > { %s920_s21 = smov (%p26_p0, %s25_s21), 0  ;;  %s922_s22 = smov (!%p26_p0, %s28_s22), %s688_s18 }
   0x9   : > { %s58_s24 = ssub.s32 %s684_s17, %s920_s21  ;;  %p69_p2 = scmp.eq.s32.totalorder %s692_s19, 0 }
   0xa   : > { %p30_p3 = scmp.ge.s32.totalorder %s922_s22, 2  ;;  %p59_p4 = scmp.eq.s32.totalorder %s58_s24, 0 }
   0xb   : > { %p773_p5 = por %p69_p2, %p68_p1  ;;  %p74_p6 = scmp.ne.s32.totalorder %s668_s13, %s664_s12 }
   0xc   : > { %s924_s22 = smov (%p30_p3, %s922_s22), 0  ;;  %p75_p7 = scmp.eq.s32.totalorder %s474_s20, 0 }
   0xd   : > { %s781_s26 = scalar_select %p59_p4, %s672_s14, %s61_s23  }
   0xe   : > { %p511_p8 = scmp.lt.s32.totalorder %s692_s19, 4  ;;  %s157_s27 = sand.u32 1, %s672_s14  }
   0xf   : > { %p785_p9 = por %p75_p7, %p74_p6  ;;  %s478_s29 = sshll.u32 %s157_s27, 4 }
  0x10   : > { %s479_s30 = sshll.u32 %s684_s17, 6  ;;  %s161_s7 = scalar_lea.vmem [#allocation6], %s478_s29 }
  0x11   : > { %s793_s6 = scalar_lea.hbm %s905_s1, %s479_s30  ;;  %s167_s8 = sshll.u32 %s161_s7, 4  ;;  %s801_s8 = int_to_ptr.vmem [resolvable:$true] %s167_s8 }
  0x12   : > { %p797_p10 = pnand %p511_p8, %p773_p5  ;;  %s804_s10 = scalar_lea.sflag [#allocation7], %s157_s27 }
  0x13   : > { %s596_s11 = scalar_lea.hbm %s793_s6, 256  ;;  %s601_s23 = scalar_lea.hbm %s905_s1, 512 }
  0x14   : > { %p597_p12 = scmp.ne.s32.totalorder %s793_s6, %s596_s11  ;;  %p598_p13 = pneg %p797_p10 }
  0x15   : > { %p602_p2 = scmp.lt.u32.totalorder %s793_s6, %s905_s1  ;;  %p603_p3 = scmp.lt.u32.totalorder %s601_s23, %s596_s11 }
  0x16   : > { %p599_p0 = pnand %p598_p13, %p597_p12  ;;  %p605_p5 = scmp.lt.u32.totalorder %s596_s11, %s793_s6 }
  0x17   : > { %p604_p4 = por %p603_p3, %p602_p2 }
  0x18   : > { %p600_p1 = pneg %p599_p0 }
  0x19   : > { %p606_p6 = por %p605_p5, %p604_p4 }
  0x1b   : > { %p607_p7 = pnand %p606_p6, %p600_p1 }
  0x1d   : > { %610 = shalt.err (!%p607_p7)
}
  0x1e   : > { %s611_s27 = scalar_lea.vmem %s801_s8, 256  ;;  %s694_s29 = smov [#allocation6]  }
  0x1f   : > { %p612_p8 = scmp.ne.s32.totalorder %s801_s8, %s611_s27  ;;  %s616_s30 = sshll.u32 %s694_s29, 4  ;;  %s617_s30 = int_to_ptr.vmem [resolvable:$false] %s616_s30 }
  0x20   : > { %s618_s4 = scalar_lea.vmem %s617_s30, 512  ;;  %p619_p11 = scmp.lt.s32.totalorder %s801_s8, %s617_s30 }
  0x21   : > { %p614_p12 = pnand %p612_p8, %p598_p13  ;;  %p620_p2 = scmp.lt.s32.totalorder %s618_s4, %s611_s27 }
  0x23   : > { %p615_p0 = pneg %p614_p12  ;;  %p621_p3 = por %p620_p2, %p619_p11 }
  0x25   : > { %p622_p4 = pnand %p621_p3, %p615_p0 }
  0x27   : > { %625 = shalt.err (!%p622_p4)
}
  0x28   : > { %s695_s5 = smov 128   ;;  %s696_s7 = smov 64  }
  0x29   : > { %s697_s11 = smov 4   ;;  %p182_p13 = scmp.lt.s32.totalorder %s692_s19, 5 }
  0x2a   : > { %510 = dma.hbm_to_vmem [thread:$0]  (!%p797_p10), %s793_s6, 256, %s801_s8, %s804_s10, %s695_s5, %s696_s7, %s697_s11  }
  0x2b   : > { %p911_p1 = scmp.ge.s32.totalorder %s692_s19, 1 }
  0x2d   : > { %p183_p5 = pnand %p911_p1, %p182_p13 }
  0x2e   : > { %s188_s12 = sand.u32 (!%p183_p5), 1, %s668_s13  }
  0x2f   : > { %186 = sbr.rel (%p183_p5) target bundleno = 908 (0x38c), region = 32  ;;  %s836_s20 = sshll.u32 (!%p183_p5), %s188_s12, 4 }
  0x30   : > { %s189_s23 = scalar_lea.sflag (!%p183_p5), [#allocation7], %s188_s12  ;;  %s192_s24 = scalar_lea.vmem (!%p183_p5), [#allocation6], %s836_s20 }
  0x36   : > { %659 = dma.done.wait (%p785_p9), %s189_s23, 256  }
  0x37   : > { %661 = vsyncadd (%p785_p9), %s189_s23, 4294967040  ;;  %p222_p10 = scmp.lt.s32.totalorder %s680_s16, 1  ;;  %p485_p9 = scmp.ne.s32.totalorder %s676_s15, 0 }
  0x38   : > { %vm241_vm0 = vcmask (!%p485_p9), 261120   ;;  %vm251_vm1 = vcmask (!%p485_p9), 7168   ;;  %v698_v3 = vmov (!%p485_p9), -inf   ;;  %v699_v4 = vmov (!%p485_p9), 0.0  }
  0x39   : > { %s926_s16 = smov (!%p222_p10, %s680_s16), 1  ;;  %238 = sbr.rel (%p485_p9) target bundleno = 224 (0xe0), region = 40 }
  0x3a   : > { %s845_s6 = sshll.u32 %s926_s16, 3  ;;  %252 = vst.msk [vmem:[#allocation3] sm:$0xff] (!%p485_p9), %vm251_vm1, %v698_v3  ;;  %253 = vst.msk [vmem:[#allocation4] sm:$0xff] (!%p485_p9), %vm251_vm1, %v699_v4  ;;  %vm249_vm2 = vcmask (!%p485_p9), 257024  }
  0x3b   : > { %s225_s10 = scalar_lea.vmem %s904_s0, %s845_s6  ;;  %s229_s29 = scalar_lea.vmem %s906_s2, %s845_s6  ;;  %254 = vst.msk [vmem:[#allocation5] sm:$0xff] (!%p485_p9), %vm251_vm1, %v699_v4 }
  0x3c   : > { %s233_s4 = scalar_lea.vmem %s907_s3, %s845_s6  ;;  %v239_v0 = vld [vmem:[%s225_s10] sm:$0xff] (!%p485_p9) }
  0x3d   : > { %v240_v1 = vmul.f32 (!%p485_p9), %v239_v0, %v239_v0 }
  0x3f   : > { %v242_v2 = vsel (!%p485_p9), %vm241_vm0, %v240_v1, 0.0 }
  0x40   : > { %243 = vadd.xlane.f32.xlu0 %v242_v2 }
  0xcd   : > { %v244_v5 = vpop.xlane.xlu0 %243 }
  0xce   : > { %v245_v6 = vmax.f32 %v244_v5, 1e-24 }
  0xd0   : > { %584 = vrsqrt.f32 %v245_v6 }
  0xda   : > { %v585_v7 = vpop.eup %584 }
  0xdb   : > { %v247_v8 = vmul.f32 %v585_v7, %v239_v0 }
  0xdd   : > { %v248_v9 = vpack.c.bf16 %v247_v8, %v247_v8 }
  0xdf   : > { %250 = vst.msk [vmem:[#allocation2] sm:$0xf] %vm249_vm2, %v248_v9 }
  0xe0 PF: > { %v588_v10 = vld [vmem:[%s192_s24] sm:$0xff]   ;;  %v700_v11 = vmov 0.0   ;;  %v589_v12 = vld [vmem:[%s192_s24 + $0x8] sm:$0xff]   ;;  %vm701_vm3 = vmmov 0   ;;  %s489_s7 = sshll.u32 %s676_s15, 7  ;;  %v702_v14 = vmov 0   ;;  %v316_v18 = vlaneseq }
  0xe1   : > { %497 = vmatprep.subr.bf16.mxu0 %v700_v11  ;;  %501 = vmatprep.mubr.msk.bf16.mxu0 %vm701_vm3, %v700_v11  ;;  %v318_v13 = vld [vmem:[%s229_s29] sm:$0xff]  ;;  %v320_v15 = vstv %s489_s7  ;;  %vm272_vm4 = vcmask 261120   ;;  %s326_s11 = ssub.s32 200, %s489_s7  ;;  %vm338_vm7 = vcmask 7168   ;;  %v344_v44 = vld [vmem:[#allocation4] sm:$0xff]  ;;  %p491_p11 = scmp.ne.s32.totalorder %s676_s15, 1 }
  0xe2   : > { %498 = vmatpush3.bf16.msra.mxu0 %v588_v10  ;;  %586 = vset.pattern.permute.xlu0 %v702_v14  ;;  %v321_v16 = vsub.s32 %v318_v13, %v320_v15  ;;  %v317_v19 = vand.u32 127, %v316_v18  ;;  %v327_v22 = vstv %s326_s11  ;;  %v340_v30 = vld [vmem:[#allocation3] sm:$0xff]  ;;  %v333_v39 = vld [vmem:[#allocation5] sm:$0xff] }
  0xe3   : > { %499 = vmatprep.subr.bf16.mxu0 %v700_v11  ;;  %587 = vset.pattern.permute.xlu1 %v702_v14 }
  0xe4   : > { %323 = vperm.xlu0 %586, %v321_v16   ;;  %vm328_vm6 = vcmp.lt.s32.totalorder %v317_v19, %v327_v22 }
  0xe6   : > { %500 = vmatpush3.bf16.msra.mxu0 %v589_v12  ;;  %v255_v17 = vld [vmem:[#allocation2] sm:$0xf] }
  0xe9   : > { %502 = vmatmul.mubr.msk.bf16.vlgmr.msra.gmra.mrb[0].mxu0 %vm272_vm4, %v255_v17 }
 0x163   : > { %v324_v20 = vpop.permute.xlu0 %323 }
 0x164   : > { %vm325_vm5 = vcmp.eq.s32.totalorder %v317_v19, %v324_v20 }
 0x1bc   : > { %v310_v21 = vpop.f32.mrb[0].mxu0 }
 0x1bd   : > { %v329_v23 = vmul.f32 15.0, %v310_v21  ;;  %v503_v24 = vpop.f32.mrb[1].mxu0 }
 0x1be   : > { %v313_v25 = vpop.f32.mrb[2].mxu0 }
 0x1bf   : > { %v490_v26 = vadd.f32 -4.5, %v329_v23  ;;  %v504_v27 = vpop.f32.mrb[3].mxu0 }
 0x1c1   : > { %v331_v28 = vsel %vm325_vm5, %v490_v26, %v329_v23 }
 0x1c2   : > { %v332_v29 = vsel %vm328_vm6, %v331_v28, -1e+30 }
 0x1c3   : > { %341 = vmax.xlane.f32.xlu0 %v332_v29  ;;  %v334_v34 = vsel %vm325_vm5, %v332_v29, 0.0 }
 0x250   : > { %v342_v31 = vpop.xlane.xlu0 %341 }
 0x251   : > { %v343_v32 = vmax.f32 %v340_v30, %v342_v31 }
 0x253   : > { %v345_v33 = vsub.f32 %v340_v30, %v343_v32  ;;  %361 = vst.msk [vmem:[#allocation3] sm:$0xff] %vm338_vm7, %v343_v32  ;;  %351 = vperm.xlu1 %587, %v343_v32  }
 0x255   : > { %v346_v42 = vmul.f32 1.442695, %v345_v33 }
 0x25a   : > { %v366_v50 = vld [vmem:[#allocation3] sm:$0xff] (!%p491_p11) }
 0x277   : > { %335 = vadd.xlane.f32.xlu1 %v334_v34 }
 0x2d2   : > { %v352_v35 = vpop.permute.xlu1 %351 }
 0x2d3   : > { %v354_v36 = vsub.f32 %v332_v29, %v352_v35 }
 0x2d5   : > { %v355_v37 = vmul.f32 1.442695, %v354_v36 }
 0x2d7   : > { %590 = vpow2.f32 %v355_v37 }
 0x2d8   : > { %592 = vpow2.f32 %v346_v42 }
 0x2e1   : > { %v591_v38 = vpop.eup %590 }
 0x2e2   : > { %357 = vadd.xlane.f32.xlu0 %v591_v38  ;;  %v593_v43 = vpop.eup %592 }
 0x2e3   : > { %v348_v45 = vmul.f32 %v593_v43, %v344_v44 }
 0x304   : > { %v336_v40 = vpop.xlane.xlu1 %335 }
 0x305   : > { %v337_v41 = vadd.f32 %v336_v40, %v333_v39 }
 0x307   : > { %339 = vst.msk [vmem:[#allocation5] sm:$0xff] %vm338_vm7, %v337_v41 }
 0x30e   : > { %v371_v52 = vld [vmem:[#allocation5] sm:$0xff] (!%p491_p11) }
 0x36c   : > { %365 = sbr.rel (%p491_p11) target bundleno = 908 (0x38c), region = 44 }
 0x36f   : > { %v358_v46 = vpop.xlane.xlu0 %357 }
 0x370   : > { %v359_v47 = vadd.f32 %v358_v46, %v348_v45 }
 0x372   : > { %360 = vst.msk [vmem:[#allocation4] sm:$0xff] %vm338_vm7, %v359_v47 }
 0x379   : > { %v367_v48 = vld [vmem:[#allocation4] sm:$0xff] }
 0x37a   : > { %594 = vlog2.f32 %v367_v48 }
 0x384   : > { %v595_v49 = vpop.eup %594 }
 0x385   : > { %v369_v51 = vmul.f32 0.6931472, %v595_v49 }
 0x387   : > { %v370_v53 = vadd.f32 %v369_v51, %v366_v50 }
 0x389   : > { %v372_v54 = vsub.f32 %v370_v53, %v371_v52 }
 0x38b   : > { %373 = vst.msk [vmem:[%s233_s4] sm:$0xff] %vm338_vm7, %v372_v54 }
 0x38c PF: > { %s16_s19 = sadd.s32 1, %s692_s19   ;;  %s912_s12 = smov %s668_s13 }
 0x38d   : > { %p13_p6 = scmp.ge.s32.totalorder %s16_s19, 6   ;;  %s913_s13 = smov %s672_s14 }
 0x38e   : > { %s914_s14 = smov %s781_s26  ;;  %s915_s15 = smov %s684_s17 }
 0x38f   : > { %s916_s16 = smov %s688_s18  ;;  %s917_s17 = smov %s920_s21 }
 0x390   : > { %s918_s18 = smov %s924_s22  ;;  %15 = sbr.rel (!%p13_p6) target bundleno = 5 (0x5), region = 86 }
 0x397   :  { %393 = vsyncpa [#allocation7], 1 }
 0x398   :  { %395 = vsyncpa [#allocation7 + $0x1], 1 }

</bundles_post_ra>
